<compile_context>
chip_gen: v7x
topology: tpu7x:2x2x1
jax: 0.10.0
libtpu: 0.0.40
codegen_flags: <defaults>
</compile_context>

<pallas_src>
import jax
import jax.numpy as jnp
from jax.experimental import pallas as pl
from jax.experimental.pallas import tpu as pltpu

# Problem sizes implied by the PyTorch module.
N, C_IN, H, W = 1, 8, 4, 4
OC, GROUPS, KH, KW = 4, 2, 3, 3
ICG = C_IN // GROUPS              # input channels per group  = 4
OCG = OC // GROUPS                # output channels per group = 2
OH, OW = H - KH + 1, W - KW + 1   # 2, 2
NTAPS = KH * KW                   # 9
WIN = (OH - 1) * W + OW           # 6-row window per tap in flat (h*W+w) space
EPS = 1e-5


def conv_bn_sum_kernel(x_ref, w_ref, sum_ref, stats_ref):
    """x_ref:     (H*W, C_IN) = (16, 8)  VMEM  input, channels-last, flat spatial
       w_ref:     (KH*KW, GROUPS, ICG, OCG)    conv weight, per-tap per-group
       sum_ref:   (1, 1)  SMEM                 scalar torch.sum(BN(conv(x)))
       stats_ref: (2, OC) VMEM                 row0: per-channel batch mean of conv
                                               row1: per-channel biased batch var
    Grouped conv = 9-tap accumulation of (WIN, ICG) @ (ICG, OCG) dots on static
    ref slices, fused with the BatchNorm statistics and the final reduction."""
    total = jnp.float32(0.0)
    means, varis = [], []
    for g in range(GROUPS):
        acc = jnp.zeros((WIN, OCG), jnp.float32)
        for t in range(NTAPS):
            kh, kw = divmod(t, KW)
            base = kh * W + kw
            xs = x_ref[base:base + WIN, g * ICG:(g + 1) * ICG]   # (WIN, ICG)
            acc = acc + jnp.dot(xs, w_ref[t, g, :, :],
                                preferred_element_type=jnp.float32)
        # Keep only rows that are valid output positions (offsets oh*W + ow).
        conv_g = jnp.concatenate(
            [acc[oh * W:oh * W + OW, :] for oh in range(OH)], axis=0)  # (OH*OW, OCG)

        # BatchNorm2d(affine=False), training mode: biased batch statistics.
        mean_g = jnp.mean(conv_g, axis=0, keepdims=True)          # (1, OCG)
        cen = conv_g - mean_g
        var_g = jnp.mean(cen * cen, axis=0, keepdims=True)        # (1, OCG)

        # sum(normed) per group == colsum(cen) * rsqrt(var + eps), summed.
        colsum = jnp.sum(cen, axis=0, keepdims=True)              # (1, OCG)
        total = total + jnp.sum(colsum * jax.lax.rsqrt(var_g + EPS))

        means.append(mean_g)
        varis.append(var_g)

    stats_ref[...] = jnp.concatenate(
        [jnp.concatenate(means, axis=1), jnp.concatenate(varis, axis=1)], axis=0)
    sum_ref[0, 0] = total


@jax.jit
def _forward_with_stats(x, w):
    """Whole forward under one jit; layout glue is pure reshape/transpose."""
    # (1, C, H, W) -> (H*W, C): channels-last, row-major flat spatial.
    x2 = x.astype(jnp.float32).reshape(C_IN, H * W).T
    # (OC, ICG, KH, KW) -> (KH*KW, GROUPS, ICG, OCG): per-tap per-group matrices.
    wt = (w.astype(jnp.float32)
          .reshape(GROUPS, OCG, ICG, KH * KW)
          .transpose(3, 0, 2, 1))
    s, stats = pl.pallas_call(
        conv_bn_sum_kernel,
        out_shape=(jax.ShapeDtypeStruct((1, 1), jnp.float32),
                   jax.ShapeDtypeStruct((2, OC), jnp.float32)),
        in_specs=[pl.BlockSpec(memory_space=pltpu.MemorySpace.VMEM),
                  pl.BlockSpec(memory_space=pltpu.MemorySpace.VMEM)],
        out_specs=(pl.BlockSpec(memory_space=pltpu.MemorySpace.SMEM),
                   pl.BlockSpec(memory_space=pltpu.MemorySpace.VMEM)),
    )(x2, wt)
    return s[0, 0], stats


def model_forward(x, w, b):
    """Equivalent of Model.forward(x1) = torch.sum(BatchNorm2d(Conv2d(x1))).

    The conv bias `b` is cancelled exactly by the BatchNorm (affine=False)
    mean subtraction, so it never reaches the kernel."""
    del b
    return _forward_with_stats(x, w)[0]


@jax.jit
def reference(x, w, b):
    """Pure-JAX reference mirroring the PyTorch semantics (bias included)."""
    conv = jax.lax.conv_general_dilated(
        x.astype(jnp.float32), w.astype(jnp.float32),
        window_strides=(1, 1), padding="VALID",
        dimension_numbers=("NCHW", "OIHW", "NCHW"),
        feature_group_count=GROUPS)
    conv = conv + b.reshape(1, OC, 1, 1)
    mean = conv.mean(axis=(0, 2, 3))
    cen = conv - mean.reshape(1, OC, 1, 1)
    var = (cen * cen).mean(axis=(0, 2, 3))
    normed = cen * jax.lax.rsqrt(var.reshape(1, OC, 1, 1) + EPS)
    return jnp.sum(normed), mean, var


if __name__ == "__main__":
    key = jax.random.PRNGKey(0)
    kx, kw, kb = jax.random.split(key, 3)

    # x1 = torch.randint(0, 6, size=(1, 8, 4, 4))  (cast to f32 for the conv)
    x1 = jax.random.randint(kx, (N, C_IN, H, W), 0, 6).astype(jnp.float32)
    # Conv weight ~ randn, shape (OC, C_IN/groups, KH, KW); bias ~ small randn.
    conv_w = jax.random.normal(kw, (OC, ICG, KH, KW), jnp.float32)
    conv_b = 0.1 * jax.random.normal(kb, (OC,), jnp.float32)
    # TODO(synk): BatchNorm running_mean/running_var buffer updates (training
    # side effect) are not modeled; they do not affect the forward output.
    # TODO(synk): the original module assigns weight/bias=ones to an
    # affine=False BatchNorm (AttributeError in PyTorch); treated as plain
    # affine=False normalization here.

    result, stats = jax.block_until_ready(_forward_with_stats(x1, conv_w))
    ref_sum, ref_mean, ref_var = jax.block_until_ready(
        reference(x1, conv_w, conv_b))

    # Intermediate checks (the final sum is analytically ~0 and proves little):
    # kernel drops the bias (BN cancels it), so add it back for the mean check.
    assert jnp.allclose(stats[0] + conv_b, ref_mean, rtol=1e-3, atol=1e-3), (
        stats[0] + conv_b, ref_mean)
    assert jnp.allclose(stats[1], ref_var, rtol=1e-3, atol=1e-3), (
        stats[1], ref_var)

    # Final scalar (both are cancellation noise around 0).
    assert jnp.isfinite(result), "non-finite kernel output"
    assert abs(float(result) - float(ref_sum)) < 1e-3, (float(result),
                                                        float(ref_sum))

    # Exercise the public wrapper (returns only the module's scalar output).
    out = jax.block_until_ready(model_forward(x1, conv_w, conv_b))
    assert abs(float(out) - float(result)) < 1e-6

    print("KERNEL_OK")
</pallas_src>

<mosaic_0001>
module attributes {stable_mosaic.version = 11 : i64} {
  func.func @conv_bn_sum_kernel(%arg0: memref<16x8xf32, #tpu.memory_space<vmem>>, %arg1: memref<9x2x4x2xf32, #tpu.memory_space<vmem>>, %arg2: memref<1x1xf32, #tpu.memory_space<smem>>, %arg3: memref<2x4xf32, #tpu.memory_space<vmem>>) attributes {dimension_semantics = [], scalar_prefetch = 0 : i64, scratch_operands = 0 : i64, tpu.core_type = #tpu.core_type<tc>} {
    %cst = arith.constant 0.000000e+00 : f32
    %0 = vector.broadcast %cst : f32 to vector<6x2xf32>
    %c0 = arith.constant 0 : index
    %c0_0 = arith.constant 0 : index
    %1 = vector.load %arg0[%c0, %c0_0] : memref<16x8xf32, #tpu.memory_space<vmem>>, vector<6x4xf32>
    %c0_1 = arith.constant 0 : index
    %c0_2 = arith.constant 0 : index
    %c0_3 = arith.constant 0 : index
    %c0_4 = arith.constant 0 : index
    %2 = vector.load %arg1[%c0_1, %c0_2, %c0_3, %c0_4] : memref<9x2x4x2xf32, #tpu.memory_space<vmem>>, vector<1x1x4x2xf32>
    %3 = vector.shape_cast %2 : vector<1x1x4x2xf32> to vector<4x2xf32>
    %cst_5 = arith.constant dense<0.000000e+00> : vector<6x2xf32>
    %4 = tpu.matmul %1, %3, %cst_5 {dimension_numbers = #tpu.dot_dimension_numbers<[1], [0], [0], [1], [0, 0, 1, 1], [], []>} : vector<6x4xf32>, vector<4x2xf32>, vector<6x2xf32> -> vector<6x2xf32>
    %5 = arith.addf %0, %4 : vector<6x2xf32>
    %c1 = arith.constant 1 : index
    %c0_6 = arith.constant 0 : index
    %6 = vector.load %arg0[%c1, %c0_6] : memref<16x8xf32, #tpu.memory_space<vmem>>, vector<6x4xf32>
    %c1_7 = arith.constant 1 : index
    %c0_8 = arith.constant 0 : index
    %c0_9 = arith.constant 0 : index
    %c0_10 = arith.constant 0 : index
    %7 = vector.load %arg1[%c1_7, %c0_8, %c0_9, %c0_10] : memref<9x2x4x2xf32, #tpu.memory_space<vmem>>, vector<1x1x4x2xf32>
    %8 = vector.shape_cast %7 : vector<1x1x4x2xf32> to vector<4x2xf32>
    %cst_11 = arith.constant dense<0.000000e+00> : vector<6x2xf32>
    %9 = tpu.matmul %6, %8, %cst_11 {dimension_numbers = #tpu.dot_dimension_numbers<[1], [0], [0], [1], [0, 0, 1, 1], [], []>} : vector<6x4xf32>, vector<4x2xf32>, vector<6x2xf32> -> vector<6x2xf32>
    %10 = arith.addf %5, %9 : vector<6x2xf32>
    %c2 = arith.constant 2 : index
    %c0_12 = arith.constant 0 : index
    %11 = vector.load %arg0[%c2, %c0_12] : memref<16x8xf32, #tpu.memory_space<vmem>>, vector<6x4xf32>
    %c2_13 = arith.constant 2 : index
    %c0_14 = arith.constant 0 : index
    %c0_15 = arith.constant 0 : index
    %c0_16 = arith.constant 0 : index
    %12 = vector.load %arg1[%c2_13, %c0_14, %c0_15, %c0_16] : memref<9x2x4x2xf32, #tpu.memory_space<vmem>>, vector<1x1x4x2xf32>
    %13 = vector.shape_cast %12 : vector<1x1x4x2xf32> to vector<4x2xf32>
    %cst_17 = arith.constant dense<0.000000e+00> : vector<6x2xf32>
    %14 = tpu.matmul %11, %13, %cst_17 {dimension_numbers = #tpu.dot_dimension_numbers<[1], [0], [0], [1], [0, 0, 1, 1], [], []>} : vector<6x4xf32>, vector<4x2xf32>, vector<6x2xf32> -> vector<6x2xf32>
    %15 = arith.addf %10, %14 : vector<6x2xf32>
    %c4 = arith.constant 4 : index
    %c0_18 = arith.constant 0 : index
    %16 = vector.load %arg0[%c4, %c0_18] : memref<16x8xf32, #tpu.memory_space<vmem>>, vector<6x4xf32>
    %c3 = arith.constant 3 : index
    %c0_19 = arith.constant 0 : index
    %c0_20 = arith.constant 0 : index
    %c0_21 = arith.constant 0 : index
    %17 = vector.load %arg1[%c3, %c0_19, %c0_20, %c0_21] : memref<9x2x4x2xf32, #tpu.memory_space<vmem>>, vector<1x1x4x2xf32>
    %18 = vector.shape_cast %17 : vector<1x1x4x2xf32> to vector<4x2xf32>
    %cst_22 = arith.constant dense<0.000000e+00> : vector<6x2xf32>
    %19 = tpu.matmul %16, %18, %cst_22 {dimension_numbers = #tpu.dot_dimension_numbers<[1], [0], [0], [1], [0, 0, 1, 1], [], []>} : vector<6x4xf32>, vector<4x2xf32>, vector<6x2xf32> -> vector<6x2xf32>
    %20 = arith.addf %15, %19 : vector<6x2xf32>
    %c5 = arith.constant 5 : index
    %c0_23 = arith.constant 0 : index
    %21 = vector.load %arg0[%c5, %c0_23] : memref<16x8xf32, #tpu.memory_space<vmem>>, vector<6x4xf32>
    %c4_24 = arith.constant 4 : index
    %c0_25 = arith.constant 0 : index
    %c0_26 = arith.constant 0 : index
    %c0_27 = arith.constant 0 : index
    %22 = vector.load %arg1[%c4_24, %c0_25, %c0_26, %c0_27] : memref<9x2x4x2xf32, #tpu.memory_space<vmem>>, vector<1x1x4x2xf32>
    %23 = vector.shape_cast %22 : vector<1x1x4x2xf32> to vector<4x2xf32>
    %cst_28 = arith.constant dense<0.000000e+00> : vector<6x2xf32>
    %24 = tpu.matmul %21, %23, %cst_28 {dimension_numbers = #tpu.dot_dimension_numbers<[1], [0], [0], [1], [0, 0, 1, 1], [], []>} : vector<6x4xf32>, vector<4x2xf32>, vector<6x2xf32> -> vector<6x2xf32>
    %25 = arith.addf %20, %24 : vector<6x2xf32>
    %c6 = arith.constant 6 : index
    %c0_29 = arith.constant 0 : index
    %26 = vector.load %arg0[%c6, %c0_29] : memref<16x8xf32, #tpu.memory_space<vmem>>, vector<6x4xf32>
    %c5_30 = arith.constant 5 : index
    %c0_31 = arith.constant 0 : index
    %c0_32 = arith.constant 0 : index
    %c0_33 = arith.constant 0 : index
    %27 = vector.load %arg1[%c5_30, %c0_31, %c0_32, %c0_33] : memref<9x2x4x2xf32, #tpu.memory_space<vmem>>, vector<1x1x4x2xf32>
    %28 = vector.shape_cast %27 : vector<1x1x4x2xf32> to vector<4x2xf32>
    %cst_34 = arith.constant dense<0.000000e+00> : vector<6x2xf32>
    %29 = tpu.matmul %26, %28, %cst_34 {dimension_numbers = #tpu.dot_dimension_numbers<[1], [0], [0], [1], [0, 0, 1, 1], [], []>} : vector<6x4xf32>, vector<4x2xf32>, vector<6x2xf32> -> vector<6x2xf32>
    %30 = arith.addf %25, %29 : vector<6x2xf32>
    %c8 = arith.constant 8 : index
    %c0_35 = arith.constant 0 : index
    %31 = vector.load %arg0[%c8, %c0_35] : memref<16x8xf32, #tpu.memory_space<vmem>>, vector<6x4xf32>
    %c6_36 = arith.constant 6 : index
    %c0_37 = arith.constant 0 : index
    %c0_38 = arith.constant 0 : index
    %c0_39 = arith.constant 0 : index
    %32 = vector.load %arg1[%c6_36, %c0_37, %c0_38, %c0_39] : memref<9x2x4x2xf32, #tpu.memory_space<vmem>>, vector<1x1x4x2xf32>
    %33 = vector.shape_cast %32 : vector<1x1x4x2xf32> to vector<4x2xf32>
    %cst_40 = arith.constant dense<0.000000e+00> : vector<6x2xf32>
    %34 = tpu.matmul %31, %33, %cst_40 {dimension_numbers = #tpu.dot_dimension_numbers<[1], [0], [0], [1], [0, 0, 1, 1], [], []>} : vector<6x4xf32>, vector<4x2xf32>, vector<6x2xf32> -> vector<6x2xf32>
    %35 = arith.addf %30, %34 : vector<6x2xf32>
    %c9 = arith.constant 9 : index
    %c0_41 = arith.constant 0 : index
    %36 = vector.load %arg0[%c9, %c0_41] : memref<16x8xf32, #tpu.memory_space<vmem>>, vector<6x4xf32>
    %c7 = arith.constant 7 : index
    %c0_42 = arith.constant 0 : index
    %c0_43 = arith.constant 0 : index
    %c0_44 = arith.constant 0 : index
    %37 = vector.load %arg1[%c7, %c0_42, %c0_43, %c0_44] : memref<9x2x4x2xf32, #tpu.memory_space<vmem>>, vector<1x1x4x2xf32>
    %38 = vector.shape_cast %37 : vector<1x1x4x2xf32> to vector<4x2xf32>
    %cst_45 = arith.constant dense<0.000000e+00> : vector<6x2xf32>
    %39 = tpu.matmul %36, %38, %cst_45 {dimension_numbers = #tpu.dot_dimension_numbers<[1], [0], [0], [1], [0, 0, 1, 1], [], []>} : vector<6x4xf32>, vector<4x2xf32>, vector<6x2xf32> -> vector<6x2xf32>
    %40 = arith.addf %35, %39 : vector<6x2xf32>
    %c10 = arith.constant 10 : index
    %c0_46 = arith.constant 0 : index
    %41 = vector.load %arg0[%c10, %c0_46] : memref<16x8xf32, #tpu.memory_space<vmem>>, vector<6x4xf32>
    %c8_47 = arith.constant 8 : index
    %c0_48 = arith.constant 0 : index
    %c0_49 = arith.constant 0 : index
    %c0_50 = arith.constant 0 : index
    %42 = vector.load %arg1[%c8_47, %c0_48, %c0_49, %c0_50] : memref<9x2x4x2xf32, #tpu.memory_space<vmem>>, vector<1x1x4x2xf32>
    %43 = vector.shape_cast %42 : vector<1x1x4x2xf32> to vector<4x2xf32>
    %cst_51 = arith.constant dense<0.000000e+00> : vector<6x2xf32>
    %44 = tpu.matmul %41, %43, %cst_51 {dimension_numbers = #tpu.dot_dimension_numbers<[1], [0], [0], [1], [0, 0, 1, 1], [], []>} : vector<6x4xf32>, vector<4x2xf32>, vector<6x2xf32> -> vector<6x2xf32>
    %45 = arith.addf %40, %44 : vector<6x2xf32>
    %46 = vector.extract_strided_slice %45 {offsets = [0, 0], sizes = [2, 2], strides = [1, 1]} : vector<6x2xf32> to vector<2x2xf32>
    %47 = vector.extract_strided_slice %45 {offsets = [4, 0], sizes = [2, 2], strides = [1, 1]} : vector<6x2xf32> to vector<2x2xf32>
    %48 = tpu.concatenate %46, %47 in 0 : vector<2x2xf32>, vector<2x2xf32> -> vector<4x2xf32>
    %cst_52 = arith.constant dense<0.000000e+00> : vector<2xf32>
    %49 = vector.multi_reduction <add>, %48, %cst_52 [0] : vector<4x2xf32> to vector<2xf32>
    %50 = vector.shape_cast %49 : vector<2xf32> to vector<1x2xf32>
    %cst_53 = arith.constant 4.000000e+00 : f32
    %51 = vector.broadcast %cst_53 : f32 to vector<1x2xf32>
    %52 = arith.divf %50, %51 : vector<1x2xf32>
    %53 = vector.broadcast %52 : vector<1x2xf32> to vector<4x2xf32>
    %54 = arith.subf %48, %53 : vector<4x2xf32>
    %55 = arith.mulf %54, %54 : vector<4x2xf32>
    %cst_54 = arith.constant dense<0.000000e+00> : vector<2xf32>
    %56 = vector.multi_reduction <add>, %55, %cst_54 [0] : vector<4x2xf32> to vector<2xf32>
    %57 = vector.shape_cast %56 : vector<2xf32> to vector<1x2xf32>
    %cst_55 = arith.constant 4.000000e+00 : f32
    %58 = vector.broadcast %cst_55 : f32 to vector<1x2xf32>
    %59 = arith.divf %57, %58 : vector<1x2xf32>
    %cst_56 = arith.constant dense<0.000000e+00> : vector<2xf32>
    %60 = vector.multi_reduction <add>, %54, %cst_56 [0] : vector<4x2xf32> to vector<2xf32>
    %61 = vector.shape_cast %60 : vector<2xf32> to vector<1x2xf32>
    %cst_57 = arith.constant 9.99999974E-6 : f32
    %62 = vector.broadcast %cst_57 : f32 to vector<1x2xf32>
    %63 = arith.addf %59, %62 : vector<1x2xf32>
    %64 = math.rsqrt %63 : vector<1x2xf32>
    %65 = arith.mulf %61, %64 : vector<1x2xf32>
    %66 = vector.shape_cast %65 : vector<1x2xf32> to vector<1x1x2xf32>
    %cst_58 = arith.constant dense<0.000000e+00> : vector<1xf32>
    %67 = vector.multi_reduction <add>, %66, %cst_58 [1, 2] : vector<1x1x2xf32> to vector<1xf32>
    %68 = vector.shape_cast %67 : vector<1xf32> to vector<1x1x1xf32>
    %69 = vector.extract %68[0, 0, 0] : f32 from vector<1x1x1xf32>
    %cst_59 = arith.constant 0.000000e+00 : f32
    %70 = arith.addf %cst_59, %69 : f32
    %cst_60 = arith.constant 0.000000e+00 : f32
    %71 = vector.broadcast %cst_60 : f32 to vector<6x2xf32>
    %c0_61 = arith.constant 0 : index
    %c4_62 = arith.constant 4 : index
    %72 = vector.load %arg0[%c0_61, %c4_62] : memref<16x8xf32, #tpu.memory_space<vmem>>, vector<6x4xf32>
    %c0_63 = arith.constant 0 : index
    %c1_64 = arith.constant 1 : index
    %c0_65 = arith.constant 0 : index
    %c0_66 = arith.constant 0 : index
    %73 = vector.load %arg1[%c0_63, %c1_64, %c0_65, %c0_66] : memref<9x2x4x2xf32, #tpu.memory_space<vmem>>, vector<1x1x4x2xf32>
    %74 = vector.shape_cast %73 : vector<1x1x4x2xf32> to vector<4x2xf32>
    %cst_67 = arith.constant dense<0.000000e+00> : vector<6x2xf32>
    %75 = tpu.matmul %72, %74, %cst_67 {dimension_numbers = #tpu.dot_dimension_numbers<[1], [0], [0], [1], [0, 0, 1, 1], [], []>} : vector<6x4xf32>, vector<4x2xf32>, vector<6x2xf32> -> vector<6x2xf32>
    %76 = arith.addf %71, %75 : vector<6x2xf32>
    %c1_68 = arith.constant 1 : index
    %c4_69 = arith.constant 4 : index
    %77 = vector.load %arg0[%c1_68, %c4_69] : memref<16x8xf32, #tpu.memory_space<vmem>>, vector<6x4xf32>
    %c1_70 = arith.constant 1 : index
    %c1_71 = arith.constant 1 : index
    %c0_72 = arith.constant 0 : index
    %c0_73 = arith.constant 0 : index
    %78 = vector.load %arg1[%c1_70, %c1_71, %c0_72, %c0_73] : memref<9x2x4x2xf32, #tpu.memory_space<vmem>>, vector<1x1x4x2xf32>
    %79 = vector.shape_cast %78 : vector<1x1x4x2xf32> to vector<4x2xf32>
    %cst_74 = arith.constant dense<0.000000e+00> : vector<6x2xf32>
    %80 = tpu.matmul %77, %79, %cst_74 {dimension_numbers = #tpu.dot_dimension_numbers<[1], [0], [0], [1], [0, 0, 1, 1], [], []>} : vector<6x4xf32>, vector<4x2xf32>, vector<6x2xf32> -> vector<6x2xf32>
    %81 = arith.addf %76, %80 : vector<6x2xf32>
    %c2_75 = arith.constant 2 : index
    %c4_76 = arith.constant 4 : index
    %82 = vector.load %arg0[%c2_75, %c4_76] : memref<16x8xf32, #tpu.memory_space<vmem>>, vector<6x4xf32>
    %c2_77 = arith.constant 2 : index
    %c1_78 = arith.constant 1 : index
    %c0_79 = arith.constant 0 : index
    %c0_80 = arith.constant 0 : index
    %83 = vector.load %arg1[%c2_77, %c1_78, %c0_79, %c0_80] : memref<9x2x4x2xf32, #tpu.memory_space<vmem>>, vector<1x1x4x2xf32>
    %84 = vector.shape_cast %83 : vector<1x1x4x2xf32> to vector<4x2xf32>
    %cst_81 = arith.constant dense<0.000000e+00> : vector<6x2xf32>
    %85 = tpu.matmul %82, %84, %cst_81 {dimension_numbers = #tpu.dot_dimension_numbers<[1], [0], [0], [1], [0, 0, 1, 1], [], []>} : vector<6x4xf32>, vector<4x2xf32>, vector<6x2xf32> -> vector<6x2xf32>
    %86 = arith.addf %81, %85 : vector<6x2xf32>
    %c4_82 = arith.constant 4 : index
    %c4_83 = arith.constant 4 : index
    %87 = vector.load %arg0[%c4_82, %c4_83] : memref<16x8xf32, #tpu.memory_space<vmem>>, vector<6x4xf32>
    %c3_84 = arith.constant 3 : index
    %c1_85 = arith.constant 1 : index
    %c0_86 = arith.constant 0 : index
    %c0_87 = arith.constant 0 : index
    %88 = vector.load %arg1[%c3_84, %c1_85, %c0_86, %c0_87] : memref<9x2x4x2xf32, #tpu.memory_space<vmem>>, vector<1x1x4x2xf32>
    %89 = vector.shape_cast %88 : vector<1x1x4x2xf32> to vector<4x2xf32>
    %cst_88 = arith.constant dense<0.000000e+00> : vector<6x2xf32>
    %90 = tpu.matmul %87, %89, %cst_88 {dimension_numbers = #tpu.dot_dimension_numbers<[1], [0], [0], [1], [0, 0, 1, 1], [], []>} : vector<6x4xf32>, vector<4x2xf32>, vector<6x2xf32> -> vector<6x2xf32>
    %91 = arith.addf %86, %90 : vector<6x2xf32>
    %c5_89 = arith.constant 5 : index
    %c4_90 = arith.constant 4 : index
    %92 = vector.load %arg0[%c5_89, %c4_90] : memref<16x8xf32, #tpu.memory_space<vmem>>, vector<6x4xf32>
    %c4_91 = arith.constant 4 : index
    %c1_92 = arith.constant 1 : index
    %c0_93 = arith.constant 0 : index
    %c0_94 = arith.constant 0 : index
    %93 = vector.load %arg1[%c4_91, %c1_92, %c0_93, %c0_94] : memref<9x2x4x2xf32, #tpu.memory_space<vmem>>, vector<1x1x4x2xf32>
    %94 = vector.shape_cast %93 : vector<1x1x4x2xf32> to vector<4x2xf32>
    %cst_95 = arith.constant dense<0.000000e+00> : vector<6x2xf32>
    %95 = tpu.matmul %92, %94, %cst_95 {dimension_numbers = #tpu.dot_dimension_numbers<[1], [0], [0], [1], [0, 0, 1, 1], [], []>} : vector<6x4xf32>, vector<4x2xf32>, vector<6x2xf32> -> vector<6x2xf32>
    %96 = arith.addf %91, %95 : vector<6x2xf32>
    %c6_96 = arith.constant 6 : index
    %c4_97 = arith.constant 4 : index
    %97 = vector.load %arg0[%c6_96, %c4_97] : memref<16x8xf32, #tpu.memory_space<vmem>>, vector<6x4xf32>
    %c5_98 = arith.constant 5 : index
    %c1_99 = arith.constant 1 : index
    %c0_100 = arith.constant 0 : index
    %c0_101 = arith.constant 0 : index
    %98 = vector.load %arg1[%c5_98, %c1_99, %c0_100, %c0_101] : memref<9x2x4x2xf32, #tpu.memory_space<vmem>>, vector<1x1x4x2xf32>
    %99 = vector.shape_cast %98 : vector<1x1x4x2xf32> to vector<4x2xf32>
    %cst_102 = arith.constant dense<0.000000e+00> : vector<6x2xf32>
    %100 = tpu.matmul %97, %99, %cst_102 {dimension_numbers = #tpu.dot_dimension_numbers<[1], [0], [0], [1], [0, 0, 1, 1], [], []>} : vector<6x4xf32>, vector<4x2xf32>, vector<6x2xf32> -> vector<6x2xf32>
    %101 = arith.addf %96, %100 : vector<6x2xf32>
    %c8_103 = arith.constant 8 : index
    %c4_104 = arith.constant 4 : index
    %102 = vector.load %arg0[%c8_103, %c4_104] : memref<16x8xf32, #tpu.memory_space<vmem>>, vector<6x4xf32>
    %c6_105 = arith.constant 6 : index
    %c1_106 = arith.constant 1 : index
    %c0_107 = arith.constant 0 : index
    %c0_108 = arith.constant 0 : index
    %103 = vector.load %arg1[%c6_105, %c1_106, %c0_107, %c0_108] : memref<9x2x4x2xf32, #tpu.memory_space<vmem>>, vector<1x1x4x2xf32>
    %104 = vector.shape_cast %103 : vector<1x1x4x2xf32> to vector<4x2xf32>
    %cst_109 = arith.constant dense<0.000000e+00> : vector<6x2xf32>
    %105 = tpu.matmul %102, %104, %cst_109 {dimension_numbers = #tpu.dot_dimension_numbers<[1], [0], [0], [1], [0, 0, 1, 1], [], []>} : vector<6x4xf32>, vector<4x2xf32>, vector<6x2xf32> -> vector<6x2xf32>
    %106 = arith.addf %101, %105 : vector<6x2xf32>
    %c9_110 = arith.constant 9 : index
    %c4_111 = arith.constant 4 : index
    %107 = vector.load %arg0[%c9_110, %c4_111] : memref<16x8xf32, #tpu.memory_space<vmem>>, vector<6x4xf32>
    %c7_112 = arith.constant 7 : index
    %c1_113 = arith.constant 1 : index
    %c0_114 = arith.constant 0 : index
    %c0_115 = arith.constant 0 : index
    %108 = vector.load %arg1[%c7_112, %c1_113, %c0_114, %c0_115] : memref<9x2x4x2xf32, #tpu.memory_space<vmem>>, vector<1x1x4x2xf32>
    %109 = vector.shape_cast %108 : vector<1x1x4x2xf32> to vector<4x2xf32>
    %cst_116 = arith.constant dense<0.000000e+00> : vector<6x2xf32>
    %110 = tpu.matmul %107, %109, %cst_116 {dimension_numbers = #tpu.dot_dimension_numbers<[1], [0], [0], [1], [0, 0, 1, 1], [], []>} : vector<6x4xf32>, vector<4x2xf32>, vector<6x2xf32> -> vector<6x2xf32>
    %111 = arith.addf %106, %110 : vector<6x2xf32>
    %c10_117 = arith.constant 10 : index
    %c4_118 = arith.constant 4 : index
    %112 = vector.load %arg0[%c10_117, %c4_118] : memref<16x8xf32, #tpu.memory_space<vmem>>, vector<6x4xf32>
    %c8_119 = arith.constant 8 : index
    %c1_120 = arith.constant 1 : index
    %c0_121 = arith.constant 0 : index
    %c0_122 = arith.constant 0 : index
    %113 = vector.load %arg1[%c8_119, %c1_120, %c0_121, %c0_122] : memref<9x2x4x2xf32, #tpu.memory_space<vmem>>, vector<1x1x4x2xf32>
    %114 = vector.shape_cast %113 : vector<1x1x4x2xf32> to vector<4x2xf32>
    %cst_123 = arith.constant dense<0.000000e+00> : vector<6x2xf32>
    %115 = tpu.matmul %112, %114, %cst_123 {dimension_numbers = #tpu.dot_dimension_numbers<[1], [0], [0], [1], [0, 0, 1, 1], [], []>} : vector<6x4xf32>, vector<4x2xf32>, vector<6x2xf32> -> vector<6x2xf32>
    %116 = arith.addf %111, %115 : vector<6x2xf32>
    %117 = vector.extract_strided_slice %116 {offsets = [0, 0], sizes = [2, 2], strides = [1, 1]} : vector<6x2xf32> to vector<2x2xf32>
    %118 = vector.extract_strided_slice %116 {offsets = [4, 0], sizes = [2, 2], strides = [1, 1]} : vector<6x2xf32> to vector<2x2xf32>
    %119 = tpu.concatenate %117, %118 in 0 : vector<2x2xf32>, vector<2x2xf32> -> vector<4x2xf32>
    %cst_124 = arith.constant dense<0.000000e+00> : vector<2xf32>
    %120 = vector.multi_reduction <add>, %119, %cst_124 [0] : vector<4x2xf32> to vector<2xf32>
    %121 = vector.shape_cast %120 : vector<2xf32> to vector<1x2xf32>
    %cst_125 = arith.constant 4.000000e+00 : f32
    %122 = vector.broadcast %cst_125 : f32 to vector<1x2xf32>
    %123 = arith.divf %121, %122 : vector<1x2xf32>
    %124 = vector.broadcast %123 : vector<1x2xf32> to vector<4x2xf32>
    %125 = arith.subf %119, %124 : vector<4x2xf32>
    %126 = arith.mulf %125, %125 : vector<4x2xf32>
    %cst_126 = arith.constant dense<0.000000e+00> : vector<2xf32>
    %127 = vector.multi_reduction <add>, %126, %cst_126 [0] : vector<4x2xf32> to vector<2xf32>
    %128 = vector.shape_cast %127 : vector<2xf32> to vector<1x2xf32>
    %cst_127 = arith.constant 4.000000e+00 : f32
    %129 = vector.broadcast %cst_127 : f32 to vector<1x2xf32>
    %130 = arith.divf %128, %129 : vector<1x2xf32>
    %cst_128 = arith.constant dense<0.000000e+00> : vector<2xf32>
    %131 = vector.multi_reduction <add>, %125, %cst_128 [0] : vector<4x2xf32> to vector<2xf32>
    %132 = vector.shape_cast %131 : vector<2xf32> to vector<1x2xf32>
    %cst_129 = arith.constant 9.99999974E-6 : f32
    %133 = vector.broadcast %cst_129 : f32 to vector<1x2xf32>
    %134 = arith.addf %130, %133 : vector<1x2xf32>
    %135 = math.rsqrt %134 : vector<1x2xf32>
    %136 = arith.mulf %132, %135 : vector<1x2xf32>
    %137 = vector.shape_cast %136 : vector<1x2xf32> to vector<1x1x2xf32>
    %cst_130 = arith.constant dense<0.000000e+00> : vector<1xf32>
    %138 = vector.multi_reduction <add>, %137, %cst_130 [1, 2] : vector<1x1x2xf32> to vector<1xf32>
    %139 = vector.shape_cast %138 : vector<1xf32> to vector<1x1x1xf32>
    %140 = vector.extract %139[0, 0, 0] : f32 from vector<1x1x1xf32>
    %141 = arith.addf %70, %140 : f32
    %142 = tpu.concatenate %52, %123 in 1 : vector<1x2xf32>, vector<1x2xf32> -> vector<1x4xf32>
    %143 = tpu.concatenate %59, %130 in 1 : vector<1x2xf32>, vector<1x2xf32> -> vector<1x4xf32>
    %144 = tpu.concatenate %142, %143 in 0 : vector<1x4xf32>, vector<1x4xf32> -> vector<2x4xf32>
    %c0_131 = arith.constant 0 : index
    %c0_132 = arith.constant 0 : index
    %145 = vector.load %arg3[%c0_131, %c0_132] : memref<2x4xf32, #tpu.memory_space<vmem>>, vector<2x4xf32>
    tpu.vector_store %arg3[%c0_131, %c0_132], %144 {strides = array<i32>} : memref<2x4xf32, #tpu.memory_space<vmem>>, vector<2x4xf32>,
    %c0_133 = arith.constant 0 : index
    %c0_134 = arith.constant 0 : index
    %146 = memref.load %arg2[%c0_133, %c0_134] : memref<1x1xf32, #tpu.memory_space<smem>>
    memref.store %141, %arg2[%c0_133, %c0_134] : memref<1x1xf32, #tpu.memory_space<smem>>
    return
  }
}

</mosaic_0001>

<bundles_post_ra>
// kernel: _forward_with_stats.1
= control target key start
LH: loop header
LB: loop body
LE: loop exit
PB: predicated region body
PF: predicated region fallthrough
CT: control target
= control target key end

     0   :  { %9 = vsyncpa [#allocation4], 0  ;;  %s1850_s16 = smov 124   ;;  %v1851_v2 = vmov 0.0   ;;  %vm24_vm0 = vcmask 1043456   ;;  %vm20_vm1 = vcmask 31744   ;;  %s2098_s0 = inlined_call_operand.vmem [shape: f32[16,8], index: 0, kind: input, shape index: {}]   ;;  %s2099_s1 = inlined_call_operand.vmem [shape: f32[9,2,4,2], index: 1, kind: input, shape index: {}]   ;;  %s2100_s2 = inlined_call_operand.hbm [shape: f32[1,1], index: 2, kind: output, shape index: {0}]   ;;  %s2101_s3 = inlined_call_operand.hbm [shape: f32[2,4], index: 3, kind: output, shape index: {1}]  }
   0x1   :  { %v17_v0 = vld [vmem:[%s2098_s0 + $0x1] sm:$0x3f]  ;;  %v1589_v1 = vld [vmem:[%s2099_s1 + $0x8] sm:$0xf]  ;;  %1678 = vmatprep.subr.mxu0 %v1851_v2  ;;  %vm1852_vm2 = vmmov 0   ;;  %1723 = vmatprep.subr.mxu1 %v1851_v2 }
   0x2   :  { %785 = vrot.lane.b32.xlu0 %v17_v0, %s1850_s16  ;;  %1679 = vmatpush3.msk.msra.mxu0 %vm24_vm0, %v1589_v1  ;;  %v15_v3 = vld [vmem:[%s2098_s0] sm:$0x3f]  ;;  %v1616_v8 = vld [vmem:[%s2099_s1 + $0xc] sm:$0xf] }
   0x3   :  { %1680 = vmatprep.mubr.msk.f32.mxu0 %vm1852_vm2, %v1851_v2  ;;  %v16_v4 = vld [vmem:[%s2099_s1] sm:$0xf]  ;;  %1683 = vmatprep.subr.mxu0 %v1851_v2  ;;  %v254_v6 = vld [vmem:[%s2098_s0 + $0x4] sm:$0x3f] }
   0x4   :  { %v174_v5 = vld [vmem:[%s2098_s0 + $0x2] sm:$0x3f]  ;;  %1681 = vmatmul.mubr.msk.f32.vlgmr.msra.gmra.mrb[0].mxu0 %vm20_vm1, %v17_v0  ;;  %1725 = vmatprep.mubr.msk.f32.mxu1 %vm1852_vm2, %v1851_v2 }
   0x5   :  { %1684 = vmatpush3.msk.msra.mxu0 %vm24_vm0, %v16_v4  ;;  %1685 = vmatprep.mubr.msk.f32.mxu0 %vm1852_vm2, %v1851_v2  ;;  %v334_v7 = vld [vmem:[%s2098_s0 + $0x5] sm:$0x3f] }
   0x6   :  { %862 = vrot.lane.b32.xlu0 %v15_v3, %s1850_s16  ;;  %941 = vrot.lane.b32.xlu1 %v174_v5, %s1850_s16 }
   0x7   :  { %1688 = vmatprep.subr.mxu0 %v1851_v2  ;;  %1724 = vmatpush3.msk.msra.mxu1 %vm24_vm0, %v1616_v8 }
   0x8   :  { %10 = vsyncpa [#allocation3], 0  ;;  %v1594_v9 = vld [vmem:[%s2099_s1 + $0x10] sm:$0xf]  ;;  %v414_v10 = vld [vmem:[%s2098_s0 + $0x6] sm:$0x3f]  ;;  %1728 = vmatprep.subr.mxu1 %v1851_v2 }
   0x9   :  { %v494_v11 = vld [vmem:[%s2098_s0 + $0x8] sm:$0x3f]  ;;  %v1597_v14 = vld [vmem:[%s2099_s1 + $0x18] sm:$0xf]  ;;  %v1600_v15 = vld [vmem:[%s2099_s1 + $0x20] sm:$0xf] }
   0xa   :  { %1021 = vrot.lane.b32.xlu1 %v254_v6, %s1850_s16  ;;  %1101 = vrot.lane.b32.xlu0 %v334_v7, %s1850_s16  ;;  %v574_v12 = vld [vmem:[%s2098_s0 + $0x9] sm:$0x3f]  ;;  %v1606_v17 = vld [vmem:[%s2099_s1 + $0x30] sm:$0xf]  ;;  %vm737_vm3 = vcmask 1041408   ;;  %vm739_vm4 = vcmask 11264  }
   0xb   :  { %v654_v13 = vld [vmem:[%s2098_s0 + $0xa] sm:$0x3f]  ;;  %v1609_v18 = vld [vmem:[%s2099_s1 + $0x38] sm:$0xf]  ;;  %v1612_v19 = vld [vmem:[%s2099_s1 + $0x40] sm:$0xf] }
   0xc   :  { %1686 = vmatmul.mubr.msk.f32.vlgmr.msra.gmra.mrb[0].mxu0 %vm20_vm1, %v15_v3  ;;  %v1603_v16 = vld [vmem:[%s2099_s1 + $0x28] sm:$0xf]  ;;  %v1615_v20 = vld [vmem:[%s2099_s1 + $0x4] sm:$0xf]  ;;  %v1621_v23 = vld [vmem:[%s2099_s1 + $0x14] sm:$0xf] }
   0xd   :  { %1689 = vmatpush3.msk.msra.mxu0 %vm24_vm0, %v1594_v9  ;;  %1690 = vmatprep.mubr.msk.f32.mxu0 %vm1852_vm2, %v1851_v2  ;;  %v1624_v25 = vld [vmem:[%s2099_s1 + $0x1c] sm:$0xf]  ;;  %v1627_v27 = vld [vmem:[%s2099_s1 + $0x24] sm:$0xf]  ;;  %v1630_v29 = vld [vmem:[%s2099_s1 + $0x2c] sm:$0xf] }
   0xe   :  { %1693 = vmatprep.subr.mxu0 %v1851_v2  ;;  %1181 = vrot.lane.b32.xlu1 %v414_v10, %s1850_s16  ;;  %v1633_v31 = vld [vmem:[%s2099_s1 + $0x34] sm:$0xf]  ;;  %v1636_v33 = vld [vmem:[%s2099_s1 + $0x3c] sm:$0xf]  ;;  %v1639_v35 = vld [vmem:[%s2099_s1 + $0x44] sm:$0xf] }
   0xf   :  { %1261 = vrot.lane.b32.xlu0 %v494_v11, %s1850_s16  ;;  %vm769_vm5 = vcmask 8192   ;;  %s1853_s1 = smov 2   ;;  %vm1546_vm6 = vcmask 15360   ;;  %s1854_s12 = smov [#allocation5]   ;;  %vm1556_vm7 = vcmask 1040384   ;;  %vm1558_vm8 = vcmask 25600  }
  0x10   :  { %s1576_s13 = sshll.u32 %s1854_s12, 4  ;;  %s1577_s13 = int_to_ptr.vmem [resolvable:$true] %s1576_s13 }
  0x11   :  { %s1814_s14 = scalar_lea.vmem %s1577_s13, 32  ;;  %p1819_p1 = scmp.lt.s32.totalorder %s1577_s13, %s1577_s13 }
  0x12   :  { %1341 = vrot.lane.b32.xlu1 %v574_v12, %s1850_s16  ;;  %p1815_p0 = scmp.ne.s32.totalorder %s1577_s13, %s1814_s14  ;;  %p1820_p2 = scmp.lt.s32.totalorder %s1814_s14, %s1814_s14 }
  0x13   :  { %1421 = vrot.lane.b32.xlu0 %v654_v13, %s1850_s16 }
  0x14   :  { %1691 = vmatmul.mubr.msk.f32.vlgmr.msra.gmra.mrb[0].mxu0 %vm20_vm1, %v174_v5  ;;  %p1821_p3 = por %p1820_p2, %p1819_p1 }
  0x15   :  { %1694 = vmatpush3.msk.msra.mxu0 %vm24_vm0, %v1597_v14  ;;  %1695 = vmatprep.mubr.msk.f32.mxu0 %vm1852_vm2, %v1851_v2 }
  0x16   :  { %1698 = vmatprep.subr.mxu0 %v1851_v2  ;;  %p1822_p4 = pnand %p1821_p3, %p1815_p0 }
  0x1c   :  { %1696 = vmatmul.mubr.msk.f32.vlgmr.msra.gmra.mrb[0].mxu0 %vm20_vm1, %v254_v6 }
  0x1d   :  { %1699 = vmatpush3.msk.msra.mxu0 %vm24_vm0, %v1600_v15  ;;  %1700 = vmatprep.mubr.msk.f32.mxu0 %vm1852_vm2, %v1851_v2 }
  0x1e   :  { %1703 = vmatprep.subr.mxu0 %v1851_v2 }
  0x24   :  { %1701 = vmatmul.mubr.msk.f32.vlgmr.msra.gmra.mrb[0].mxu0 %vm20_vm1, %v334_v7 }
  0x25   :  { %1704 = vmatpush3.msk.msra.mxu0 %vm24_vm0, %v1603_v16  ;;  %1705 = vmatprep.mubr.msk.f32.mxu0 %vm1852_vm2, %v1851_v2 }
  0x26   :  { %1708 = vmatprep.subr.mxu0 %v1851_v2 }
  0x2c   :  { %1706 = vmatmul.mubr.msk.f32.vlgmr.msra.gmra.mrb[0].mxu0 %vm20_vm1, %v414_v10 }
  0x2d   :  { %1709 = vmatpush3.msk.msra.mxu0 %vm24_vm0, %v1606_v17  ;;  %1710 = vmatprep.mubr.msk.f32.mxu0 %vm1852_vm2, %v1851_v2 }
  0x2e   :  { %1713 = vmatprep.subr.mxu0 %v1851_v2 }
  0x34   :  { %1711 = vmatmul.mubr.msk.f32.vlgmr.msra.gmra.mrb[0].mxu0 %vm20_vm1, %v494_v11 }
  0x35   :  { %1714 = vmatpush3.msk.msra.mxu0 %vm24_vm0, %v1609_v18  ;;  %1715 = vmatprep.mubr.msk.f32.mxu0 %vm1852_vm2, %v1851_v2 }
  0x36   :  { %1718 = vmatprep.subr.mxu0 %v1851_v2 }
  0x3c   :  { %1716 = vmatmul.mubr.msk.f32.vlgmr.msra.gmra.mrb[0].mxu0 %vm20_vm1, %v574_v12 }
  0x3d   :  { %1719 = vmatpush3.msk.msra.mxu0 %vm24_vm0, %v1612_v19  ;;  %1720 = vmatprep.mubr.msk.f32.mxu0 %vm1852_vm2, %v1851_v2 }
  0x44   :  { %1721 = vmatmul.mubr.msk.f32.vlgmr.msra.gmra.mrb[0].mxu0 %vm20_vm1, %v654_v13 }
  0x74   :  { %v786_v21 = vpop.permute.xlu0 %785 }
  0x75   :  { %1726 = vmatmul.mubr.msk.f32.vlgmr.msra.gmra.mrb[0].mxu1 %vm20_vm1, %v786_v21 }
  0x76   :  { %1729 = vmatpush3.msk.msra.mxu1 %vm24_vm0, %v1615_v20  ;;  %1730 = vmatprep.mubr.msk.f32.mxu1 %vm1852_vm2, %v1851_v2 }
  0x77   :  { %1733 = vmatprep.subr.mxu1 %v1851_v2 }
  0x78   :  { %v863_v22 = vpop.permute.xlu0 %862  ;;  %v942_v24 = vpop.permute.xlu1 %941 }
  0x7c   :  { %v1022_v26 = vpop.permute.xlu1 %1021  ;;  %v1102_v28 = vpop.permute.xlu0 %1101 }
  0x7d   :  { %1731 = vmatmul.mubr.msk.f32.vlgmr.msra.gmra.mrb[0].mxu1 %vm20_vm1, %v863_v22 }
  0x7e   :  { %1734 = vmatpush3.msk.msra.mxu1 %vm24_vm0, %v1621_v23  ;;  %1735 = vmatprep.mubr.msk.f32.mxu1 %vm1852_vm2, %v1851_v2 }
  0x7f   :  { %1738 = vmatprep.subr.mxu1 %v1851_v2 }
  0x80   :  { %v1182_v30 = vpop.permute.xlu1 %1181 }
  0x81   :  { %v1262_v32 = vpop.permute.xlu0 %1261 }
  0x84   :  { %v1342_v34 = vpop.permute.xlu1 %1341 }
  0x85   :  { %1736 = vmatmul.mubr.msk.f32.vlgmr.msra.gmra.mrb[0].mxu1 %vm20_vm1, %v942_v24  ;;  %v1422_v36 = vpop.permute.xlu0 %1421 }
  0x86   :  { %1739 = vmatpush3.msk.msra.mxu1 %vm24_vm0, %v1624_v25  ;;  %1740 = vmatprep.mubr.msk.f32.mxu1 %vm1852_vm2, %v1851_v2 }
  0x87   :  { %1743 = vmatprep.subr.mxu1 %v1851_v2 }
  0x8d   :  { %1741 = vmatmul.mubr.msk.f32.vlgmr.msra.gmra.mrb[0].mxu1 %vm20_vm1, %v1022_v26 }
  0x8e   :  { %1744 = vmatpush3.msk.msra.mxu1 %vm24_vm0, %v1627_v27  ;;  %1745 = vmatprep.mubr.msk.f32.mxu1 %vm1852_vm2, %v1851_v2 }
  0x8f   :  { %1748 = vmatprep.subr.mxu1 %v1851_v2 }
  0x95   :  { %1746 = vmatmul.mubr.msk.f32.vlgmr.msra.gmra.mrb[0].mxu1 %vm20_vm1, %v1102_v28 }
  0x96   :  { %1749 = vmatpush3.msk.msra.mxu1 %vm24_vm0, %v1630_v29  ;;  %1750 = vmatprep.mubr.msk.f32.mxu1 %vm1852_vm2, %v1851_v2 }
  0x97   :  { %1753 = vmatprep.subr.mxu1 %v1851_v2 }
  0x9d   :  { %1751 = vmatmul.mubr.msk.f32.vlgmr.msra.gmra.mrb[0].mxu1 %vm20_vm1, %v1182_v30 }
  0x9e   :  { %1754 = vmatpush3.msk.msra.mxu1 %vm24_vm0, %v1633_v31  ;;  %1755 = vmatprep.mubr.msk.f32.mxu1 %vm1852_vm2, %v1851_v2 }
  0x9f   :  { %1758 = vmatprep.subr.mxu1 %v1851_v2 }
  0xa5   :  { %1756 = vmatmul.mubr.msk.f32.vlgmr.msra.gmra.mrb[0].mxu1 %vm20_vm1, %v1262_v32 }
  0xa6   :  { %1759 = vmatpush3.msk.msra.mxu1 %vm24_vm0, %v1636_v33  ;;  %1760 = vmatprep.mubr.msk.f32.mxu1 %vm1852_vm2, %v1851_v2 }
  0xa7   :  { %1763 = vmatprep.subr.mxu1 %v1851_v2 }
  0xad   :  { %1761 = vmatmul.mubr.msk.f32.vlgmr.msra.gmra.mrb[0].mxu1 %vm20_vm1, %v1342_v34 }
  0xae   :  { %1764 = vmatpush3.msk.msra.mxu1 %vm24_vm0, %v1639_v35  ;;  %1765 = vmatprep.mubr.msk.f32.mxu1 %vm1852_vm2, %v1851_v2 }
  0xb5   :  { %1766 = vmatmul.mubr.msk.f32.vlgmr.msra.gmra.mrb[0].mxu1 %vm20_vm1, %v1422_v36 }
 0x117   :  { %v729_v37 = vpop.f32.mrb[0].mxu0 }
 0x118   :  { %v735_v38 = vrot.slane %v729_v37, 2  ;;  %v1722_v39 = vpop.f32.mrb[1].mxu0 }
 0x11a   :  { %v738_v40 = vsel %vm737_vm3, %v729_v37, %v735_v38 }
 0x11b   :  { %v740_v41 = vsel %vm739_vm4, %v738_v40, 0.0 }
 0x11c   :  { %v741_v42 = vrot.slane %v740_v41, 4 }
 0x11e   :  { %v742_v43 = vadd.f32 %v741_v42, %v740_v41 }
 0x120   :  { %v743_v44 = vrot.slane %v742_v43, 2 }
 0x122   :  { %v744_v45 = vadd.f32 %v743_v44, %v742_v43 }
 0x124   :  { %v745_v46 = vrot.slane %v744_v45, 1 }
 0x126   :  { %v746_v47 = vadd.f32 %v745_v46, %v744_v45 }
 0x128   :  { %v2058_v48 = vmul.f32 0.25, %v746_v47 }
 0x12a   :  { %v749_v49 = vsub.f32 %v738_v40, %v2058_v48 }
 0x12c   :  { %v750_v50 = vmul.f32 %v749_v49, %v749_v49  ;;  %v759_v53 = vsel %vm739_vm4, %v749_v49, 0.0 }
 0x12d   :  { %v760_v55 = vrot.slane %v759_v53, 4 }
 0x12e   :  { %v751_v51 = vsel %vm739_vm4, %v750_v50, 0.0 }
 0x12f   :  { %v752_v52 = vrot.slane %v751_v51, 4  ;;  %v761_v58 = vadd.f32 %v760_v55, %v759_v53 }
 0x131   :  { %v753_v54 = vadd.f32 %v752_v52, %v751_v51  ;;  %v762_v61 = vrot.slane %v761_v58, 2 }
 0x133   :  { %v754_v56 = vrot.slane %v753_v54, 2  ;;  %v763_v0 = vadd.f32 %v762_v61, %v761_v58 }
 0x135   :  { %v755_v57 = vadd.f32 %v754_v56, %v753_v54  ;;  %v764_v1 = vrot.slane %v763_v0, 1 }
 0x137   :  { %v756_v59 = vrot.slane %v755_v57, 1  ;;  %v765_v2 = vadd.f32 %v764_v1, %v763_v0 }
 0x139   :  { %v757_v60 = vadd.f32 %v756_v59, %v755_v57 }
 0x13b   :  { %v2063_v62 = vmul.f32 0.25, %v757_v60 }
 0x13d   :  { %v766_v63 = vadd.f32 1e-05, %v2063_v62 }
 0x13f   :  { %1810 = vrsqrt.f32 %v766_v63 }
 0x149   :  { %v1811_v3 = vpop.eup %1810 }
 0x14a   :  { %v768_v4 = vmul.f32 %v1811_v3, %v765_v2 }
 0x14c   :  { %v770_v5 = vsel %vm769_vm5, %v768_v4, 0.0 }
 0x14d   :  { %771 = vadd.xlane.f32.xlu1 %v770_v5 }
 0x188   :  { %v1494_v6 = vpop.f32.mrb[0].mxu1 }
 0x189   :  { %v1500_v7 = vrot.slane %v1494_v6, 2  ;;  %v1767_v8 = vpop.f32.mrb[1].mxu1 }
 0x18b   :  { %v1502_v9 = vsel %vm737_vm3, %v1494_v6, %v1500_v7 }
 0x18c   :  { %v1503_v10 = vsel %vm739_vm4, %v1502_v9, 0.0 }
 0x18d   :  { %v1504_v11 = vrot.slane %v1503_v10, 4 }
 0x18f   :  { %v1505_v12 = vadd.f32 %v1504_v11, %v1503_v10 }
 0x191   :  { %v1506_v13 = vrot.slane %v1505_v12, 2 }
 0x193   :  { %v1507_v14 = vadd.f32 %v1506_v13, %v1505_v12 }
 0x195   :  { %v1508_v15 = vrot.slane %v1507_v14, 1 }
 0x197   :  { %v1509_v16 = vadd.f32 %v1508_v15, %v1507_v14 }
 0x199   :  { %v1510_v17 = vmul.f32 0.25, %v1509_v16 }
 0x19b   :  { %v1511_v18 = vsub.f32 %v1502_v9, %v1510_v17  ;;  %1543 = vrot.lane.b32.xlu1 %v1510_v17, %s1853_s1 }
 0x19d   :  { %v1512_v19 = vmul.f32 %v1511_v18, %v1511_v18  ;;  %v1521_v23 = vsel %vm739_vm4, %v1511_v18, 0.0 }
 0x19e   :  { %v1522_v25 = vrot.slane %v1521_v23, 4 }
 0x19f   :  { %v1513_v20 = vsel %vm739_vm4, %v1512_v19, 0.0 }
 0x1a0   :  { %v1514_v21 = vrot.slane %v1513_v20, 4  ;;  %v1523_v28 = vadd.f32 %v1522_v25, %v1521_v23 }
 0x1a2   :  { %v1515_v22 = vadd.f32 %v1514_v21, %v1513_v20  ;;  %v1524_v31 = vrot.slane %v1523_v28, 2 }
 0x1a4   :  { %v1516_v24 = vrot.slane %v1515_v22, 2  ;;  %v1525_v33 = vadd.f32 %v1524_v31, %v1523_v28 }
 0x1a6   :  { %v1517_v26 = vadd.f32 %v1516_v24, %v1515_v22  ;;  %v1526_v34 = vrot.slane %v1525_v33, 1 }
 0x1a8   :  { %v1518_v27 = vrot.slane %v1517_v26, 1  ;;  %v1527_v35 = vadd.f32 %v1526_v34, %v1525_v33 }
 0x1aa   :  { %v1519_v29 = vadd.f32 %v1518_v27, %v1517_v26 }
 0x1ac   :  { %v1520_v30 = vmul.f32 0.25, %v1519_v29 }
 0x1ae   :  { %v1528_v32 = vadd.f32 1e-05, %v1520_v30 }
 0x1b0   :  { %1812 = vrsqrt.f32 %v1528_v32 }
 0x1ba   :  { %v1813_v36 = vpop.eup %1812 }
 0x1bb   :  { %v1530_v37 = vmul.f32 %v1813_v36, %v1527_v35 }
 0x1bd   :  { %v1531_v38 = vsel %vm769_vm5, %v1530_v37, 0.0 }
 0x1be   :  { %1532 = vadd.xlane.f32.xlu0 %v1531_v38 }
 0x1d4   :  { %1549 = vrot.lane.b32.xlu0 %v1520_v30, %s1853_s1 }
 0x1da   :  { %v772_v39 = vpop.xlane.xlu1 %771 }
 0x1db   :  { %v773_v40 = vrot.slane %v772_v39, 4 }
 0x1dd   :  { %v774_v41 = vadd.f32 %v773_v40, %v772_v39 }
 0x1df   :  { %v775_v42 = vrot.slane %v774_v41, 2 }
 0x1e1   :  { %v776_v43 = vadd.f32 %v775_v42, %v774_v41 }
 0x1e3   :  { %v777_v44 = vrot.slane %v776_v43, 1 }
 0x1e5   :  { %v778_v45 = vadd.f32 %v777_v44, %v776_v43 }
 0x1e7   :  { %1800 = vpush %v778_v45 }
 0x20d   :  { %v1544_v50 = vpop.permute.xlu1 %1543 }
 0x20e   :  { %v1547_v55 = vsel %vm1546_vm6, %v2058_v48, %v1544_v50 }
 0x24b   :  { %v1533_v46 = vpop.xlane.xlu0 %1532 }
 0x24c   :  { %v1534_v47 = vrot.slane %v1533_v46, 4 }
 0x24e   :  { %v1535_v49 = vadd.f32 %v1534_v47, %v1533_v46 }
 0x24f   :  { %v1550_v51 = vpop.permute.xlu0 %1549 }
 0x250   :  { %v1536_v52 = vrot.slane %v1535_v49, 2  ;;  %v1552_v53 = vsel %vm1546_vm6, %v2063_v62, %v1550_v51 }
 0x251   :  { %v1554_v54 = vrot.slane %v1552_v53, 7 }
 0x252   :  { %v1537_v56 = vadd.f32 %v1536_v52, %v1535_v49 }
 0x253   :  { %v1557_v57 = vsel %vm1556_vm7, %v1547_v55, %v1554_v54 }
 0x254   :  { %v1538_v58 = vrot.slane %v1537_v56, 1  ;;  %1559 = vst.msk [vmem:[#allocation5] sm:$0x3] %vm1558_vm8, %v1557_v57 }
 0x255   :  { %1825 = shalt.err (!%p1822_p4)
}
 0x256   :  { %s1826_s16 = scalar_lea.hbm %s2101_s3, 32 }
 0x257   :  { %p1827_p5 = scmp.ne.s32.totalorder %s2101_s3, %s1826_s16  ;;  %p1830_p6 = scmp.lt.u32.totalorder %s1826_s16, %s2101_s3 }
 0x259   :  { %p1832_p7 = pnand %p1830_p6, %p1827_p5 }
 0x25b   :  { %1835 = shalt.err (!%p1832_p7)
}
 0x25c   :  { %1579 = dma.vmem_to_hbm [thread:$0]  %s1577_s13, 32, %s2101_s3, [#allocation3]   ;;  %v1539_v48 = vadd.f32 %v1538_v58, %v1537_v56 }
 0x25d   :  { %s1801_s23 = spop %1800  ;;  %s1836_s28 = scalar_lea.hbm %s2100_s2, 16 }
 0x25e   :  { %1802 = vpush %v1539_v48  ;;  %p1837_p8 = scmp.ne.s32.totalorder %s2100_s2, %s1836_s28  ;;  %p1840_p9 = scmp.lt.u32.totalorder %s1836_s28, %s2100_s2 }
 0x260   :  { %p1842_p10 = pnand %p1840_p9, %p1837_p8 }
 0x28f   :  { %s1803_s24 = spop %1802 }
 0x290   :  { %s1541_s25 = sadd.f32 %s1803_s24, %s1801_s23 }
 0x292   :  { %1561 = sst [smem:[#allocation2]] %s1541_s25 }
 0x293   :  { %1845 = shalt.err (!%p1842_p10)
}
 0x294   :  { %s1855_s3 = smov [#allocation2]  }
 0x295   :  { %1569 = dma.smem_to_hbm %s1855_s3, 16, %s2100_s2, [#allocation4]  }
 0x296   :  { %1846 = dma.done.wait [#allocation4], 16  }
 0x297   :  { %1847 = vsyncadd [#allocation4], 4294967280 }
 0x298   :  { %1848 = dma.done.wait [#allocation3], 32  }
 0x299   :  { %1849 = vsyncadd [#allocation3], 4294967264 }
 0x29a   :  { %1586 = sfence }
 0x29b   :  { %1587 = vsyncpa [#allocation3], 1 }
 0x29c   :  { %1588 = vsyncpa [#allocation4], 1 }

</bundles_post_ra>
